<compile_context>
chip_gen: v7x
topology: tpu7x:2x2x1
jax: 0.10.0
libtpu: 0.0.40
codegen_flags: <defaults>
</compile_context>

<pallas_src>
import jax
import jax.numpy as jnp
from jax.experimental import pallas as pl
from jax.experimental.pallas import tpu as pltpu


def kmeans_margin_kernel(c_ref, cc_ref, x_ref, out_ref):
    # c_ref:  (K, D)  full centroid table (constant block, stays resident)
    # cc_ref: (K, 1)  per-centroid squared norms (precomputed in wrapper)
    # x_ref:  (tn, D) tile of samples
    # out_ref:(1, tn) lane-dense margin output for this tile
    c = c_ref[...]                                   # (K, D)
    x = x_ref[...]                                   # (tn, D)

    # e[k, n] = ||c_k||^2 - 2 <c_k, x_n>.  The ||x_n||^2 term is a constant
    # offset per column and cancels in (2nd-smallest - smallest), so it is
    # never computed.  MXU matmul, result already in (K, tn) layout so K sits
    # on sublanes and the sample index is lane-dense.
    xc = jax.lax.dot_general(
        c, x, (((1,), (1,)), ((), ())),
        preferred_element_type=jnp.float32)          # (K, tn)
    e = cc_ref[...] - 2.0 * xc                       # (K, tn), broadcast over lanes

    # Unrolled VPU tournament over the K sublane rows: running smallest (m1)
    # and second-smallest (m2).  Exact ties give m2 == m1, matching torch.topk.
    K = e.shape[0]
    a = e[0:1, :]
    b = e[1:2, :]
    m1 = jnp.minimum(a, b)                           # (1, tn)
    m2 = jnp.maximum(a, b)                           # (1, tn)
    for k in range(2, K):                            # static unroll, K is small
        v = e[k:k + 1, :]
        m2 = jnp.minimum(m2, jnp.maximum(m1, v))
        m1 = jnp.minimum(m1, v)

    out_ref[...] = (m2 - m1).astype(out_ref.dtype)   # (1, tn), unmasked lane-dense store


def kmeans_forward(x, centroids, *, tn=512):
    """Pallas implementation of KMeans.forward. Returns fx of shape (N,)."""
    N, D = x.shape
    K, Dc = centroids.shape
    assert D == Dc
    assert K >= 2, "need at least 2 clusters for a top-2 margin"
    tn = min(tn, N)
    assert N % tn == 0, "N must be divisible by the row tile size"
    assert tn % 8 == 0, "row tile must be a multiple of 8 (sublane tiling)"

    x = x.astype(jnp.float32)
    c = centroids.astype(jnp.float32)
    # Hoisted: centroid squared norms, computed once outside the grid loop.
    cc = jnp.sum(c * c, axis=-1, keepdims=True)      # (K, 1)

    out = pl.pallas_call(
        kmeans_margin_kernel,
        out_shape=jax.ShapeDtypeStruct((1, N), jnp.float32),
        grid=(N // tn,),
        in_specs=[
            pl.BlockSpec((K, D), lambda i: (0, 0)),   # centroids (resident)
            pl.BlockSpec((K, 1), lambda i: (0, 0)),   # centroid norms (resident)
            pl.BlockSpec((tn, D), lambda i: (i, 0)),  # sample row tile
        ],
        out_specs=pl.BlockSpec((1, tn), lambda i: (0, i)),  # lane-dense slab
        compiler_params=pltpu.CompilerParams(
            dimension_semantics=("parallel",)),       # shards across TCs (v7x)
    )(c, cc, x)
    return out[0]                                     # (N,), matches .squeeze()


def kmeans_forward_ref(x, centroids):
    """Pure-JAX reference for correctness check."""
    x = x.astype(jnp.float32)
    centroids = centroids.astype(jnp.float32)
    d = jnp.sum((x[:, None, :] - centroids[None, :, :]) ** 2, axis=-1)
    top2 = -jax.lax.top_k(-d, 2)[0]                  # two smallest, ascending
    return top2[:, 1] - top2[:, 0]


if __name__ == "__main__":
    key = jax.random.PRNGKey(0)
    k_x, k_c = jax.random.split(key)

    # Small shapes consistent with the module: N samples, D features, K clusters.
    # N chosen so the grid has 4 steps at tn=512 (keeps both v7x cores busy).
    N, D, K = 2048, 32, 8
    x = jax.random.normal(k_x, (N, D), dtype=jnp.float32)
    # Deterministic synthetic "fitted" centroids (the module's fit() is sklearn;
    # centroid fitting is outside the forward pass, so we just initialize them).
    centroids = jax.random.normal(k_c, (K, D), dtype=jnp.float32)

    fx = kmeans_forward(x, centroids)
    fx = jax.block_until_ready(fx)

    fx_ref = kmeans_forward_ref(x, centroids)
    assert fx.shape == (N,)
    assert jnp.allclose(fx, fx_ref, atol=1e-3, rtol=1e-3), "mismatch vs reference"

    print("KERNEL_OK")
</pallas_src>

<mosaic_0001>
module attributes {stable_mosaic.version = 11 : i64} {
  func.func @kmeans_margin_kernel(%arg0: i32, %arg1: memref<8x32xf32, #tpu.memory_space<vmem>>, %arg2: memref<8x1xf32, #tpu.memory_space<vmem>>, %arg3: memref<512x32xf32, #tpu.memory_space<vmem>>, %arg4: memref<1x512xf32, #tpu.memory_space<vmem>>) attributes {dimension_semantics = [#tpu.dimension_semantics<parallel>], iteration_bounds = array<i64: 4>, scalar_prefetch = 0 : i64, scratch_operands = 0 : i64, tpu.core_type = #tpu.core_type<tc>, window_params = [{pipeline_mode = #tpu.pipeline_mode<synchronous>, transform_indices = @transform_0, window_bounds = array<i64: 8, 32>}, {pipeline_mode = #tpu.pipeline_mode<synchronous>, transform_indices = @transform_1, window_bounds = array<i64: 8, 1>}, {transform_indices = @transform_2, window_bounds = array<i64: 512, 32>}, {transform_indices = @transform_3, window_bounds = array<i64: 1, 512>}]} {
    %c0 = arith.constant 0 : index
    %c0_0 = arith.constant 0 : index
    %0 = vector.load %arg1[%c0, %c0_0] : memref<8x32xf32, #tpu.memory_space<vmem>>, vector<8x32xf32>
    %c0_1 = arith.constant 0 : index
    %c0_2 = arith.constant 0 : index
    %1 = vector.load %arg3[%c0_1, %c0_2] : memref<512x32xf32, #tpu.memory_space<vmem>>, vector<512x32xf32>
    %cst = arith.constant dense<0.000000e+00> : vector<8x512xf32>
    %2 = tpu.matmul %0, %1, %cst {dimension_numbers = #tpu.dot_dimension_numbers<[1], [1], [0], [0], [0, 0, 1, 0], [], []>} : vector<8x32xf32>, vector<512x32xf32>, vector<8x512xf32> -> vector<8x512xf32>
    %c0_3 = arith.constant 0 : index
    %c0_4 = arith.constant 0 : index
    %3 = vector.load %arg2[%c0_3, %c0_4] : memref<8x1xf32, #tpu.memory_space<vmem>>, vector<8x1xf32>
    %cst_5 = arith.constant 2.000000e+00 : f32
    %4 = vector.broadcast %cst_5 : f32 to vector<8x512xf32>
    %5 = arith.mulf %4, %2 : vector<8x512xf32>
    %6 = vector.broadcast %3 : vector<8x1xf32> to vector<8x512xf32>
    %7 = arith.subf %6, %5 : vector<8x512xf32>
    %8 = vector.extract_strided_slice %7 {offsets = [0, 0], sizes = [1, 512], strides = [1, 1]} : vector<8x512xf32> to vector<1x512xf32>
    %9 = vector.extract_strided_slice %7 {offsets = [1, 0], sizes = [1, 512], strides = [1, 1]} : vector<8x512xf32> to vector<1x512xf32>
    %10 = arith.minimumf %8, %9 : vector<1x512xf32>
    %11 = arith.maximumf %8, %9 : vector<1x512xf32>
    %12 = vector.extract_strided_slice %7 {offsets = [2, 0], sizes = [1, 512], strides = [1, 1]} : vector<8x512xf32> to vector<1x512xf32>
    %13 = arith.maximumf %10, %12 : vector<1x512xf32>
    %14 = arith.minimumf %11, %13 : vector<1x512xf32>
    %15 = arith.minimumf %10, %12 : vector<1x512xf32>
    %16 = vector.extract_strided_slice %7 {offsets = [3, 0], sizes = [1, 512], strides = [1, 1]} : vector<8x512xf32> to vector<1x512xf32>
    %17 = arith.maximumf %15, %16 : vector<1x512xf32>
    %18 = arith.minimumf %14, %17 : vector<1x512xf32>
    %19 = arith.minimumf %15, %16 : vector<1x512xf32>
    %20 = vector.extract_strided_slice %7 {offsets = [4, 0], sizes = [1, 512], strides = [1, 1]} : vector<8x512xf32> to vector<1x512xf32>
    %21 = arith.maximumf %19, %20 : vector<1x512xf32>
    %22 = arith.minimumf %18, %21 : vector<1x512xf32>
    %23 = arith.minimumf %19, %20 : vector<1x512xf32>
    %24 = vector.extract_strided_slice %7 {offsets = [5, 0], sizes = [1, 512], strides = [1, 1]} : vector<8x512xf32> to vector<1x512xf32>
    %25 = arith.maximumf %23, %24 : vector<1x512xf32>
    %26 = arith.minimumf %22, %25 : vector<1x512xf32>
    %27 = arith.minimumf %23, %24 : vector<1x512xf32>
    %28 = vector.extract_strided_slice %7 {offsets = [6, 0], sizes = [1, 512], strides = [1, 1]} : vector<8x512xf32> to vector<1x512xf32>
    %29 = arith.maximumf %27, %28 : vector<1x512xf32>
    %30 = arith.minimumf %26, %29 : vector<1x512xf32>
    %31 = arith.minimumf %27, %28 : vector<1x512xf32>
    %32 = vector.extract_strided_slice %7 {offsets = [7, 0], sizes = [1, 512], strides = [1, 1]} : vector<8x512xf32> to vector<1x512xf32>
    %33 = arith.maximumf %31, %32 : vector<1x512xf32>
    %34 = arith.minimumf %30, %33 : vector<1x512xf32>
    %35 = arith.minimumf %31, %32 : vector<1x512xf32>
    %36 = arith.subf %34, %35 : vector<1x512xf32>
    %c0_6 = arith.constant 0 : index
    %c0_7 = arith.constant 0 : index
    %37 = vector.load %arg4[%c0_6, %c0_7] : memref<1x512xf32, #tpu.memory_space<vmem>>, vector<1x512xf32>
    tpu.vector_store %arg4[%c0_6, %c0_7], %36 {strides = array<i32>} : memref<1x512xf32, #tpu.memory_space<vmem>>, vector<1x512xf32>,
    return
  }
  func.func @transform_0(%arg0: i32) -> (i32, i32) {
    %c0_i32 = arith.constant 0 : i32
    %c0_i32_0 = arith.constant 0 : i32
    %c0_i32_1 = arith.constant 0 : i32
    return %c0_i32, %c0_i32_0 : i32, i32
  }
  func.func @transform_1(%arg0: i32) -> (i32, i32) {
    %c0_i32 = arith.constant 0 : i32
    %c0_i32_0 = arith.constant 0 : i32
    %c0_i32_1 = arith.constant 0 : i32
    return %c0_i32, %c0_i32_0 : i32, i32
  }
  func.func @transform_2(%arg0: i32) -> (i32, i32) {
    %c0_i32 = arith.constant 0 : i32
    %c0_i32_0 = arith.constant 0 : i32
    return %arg0, %c0_i32 : i32, i32
  }
  func.func @transform_3(%arg0: i32) -> (i32, i32) {
    %c0_i32 = arith.constant 0 : i32
    %c0_i32_0 = arith.constant 0 : i32
    return %c0_i32, %arg0 : i32, i32
  }
}

</mosaic_0001>

<bundles_post_ra>
// kernel: tpu_custom_call.1
= control target key start
LH: loop header
LB: loop body
LE: loop exit
PB: predicated region body
PF: predicated region fallthrough
CT: control target
= control target key end

     0   :  { %8 = vsyncpa [#allocation3], 0  ;;  %s1516_s0 = inlined_call_operand.vmem [shape: f32[8,32], index: 0, kind: input, shape index: {}]   ;;  %s1517_s1 = inlined_call_operand.vmem [shape: f32[8,1], index: 1, kind: input, shape index: {}]   ;;  %s1518_s2 = inlined_call_operand.vmem [shape: f32[2048,32], index: 2, kind: input, shape index: {}]   ;;  %s1519_s3 = inlined_call_operand.hbm [shape: f32[1,2048], index: 3, kind: output, shape index: {}]  }
   0x1   :  { %10 = vsyncpa [#allocation3 + $0x1], 0  ;;  %s1213_s12 = smov 0   ;;  %s1215_s13 = smov 0  }
   0x2   :  { %s1217_s14 = smov 0   ;;  %s1219_s15 = smov 0  }
   0x3 LB: > { %s840_s16 = sadd.s32 4294967295, %s1188_s15   ;;  %s841_s17 = sadd.s32 4294967294, %s1188_s15   ;;  %s1188_s15 = sphi %s1219_s15, %s1527_s15   ;;  %s1184_s14 = sphi %s1217_s14, %s1526_s14   ;;  %s1180_s13 = sphi %s1215_s13, %s1525_s13   ;;  %s1176_s12 = sphi %s1213_s12, %s1524_s12  }
   0x4   : > { %s1236_s18 = sadd.s32 1, %s1188_s15   ;;  %s91_s19 = sadd.s32 1, %s1184_s14 }
   0x5   : > { %s88_s20 = ssub.s32 %s1188_s15, %s1236_s18  ;;  %p101_p0 = scmp.ne.s32.totalorder %s1184_s14, %s1180_s13 }
   0x6   : > { %p89_p1 = scmp.eq.s32.totalorder %s88_s20, 0  ;;  %p102_p2 = scmp.eq.s32.totalorder %s840_s16, 3 }
   0x7   : > { %p107_p3 = scmp.ne.s32.totalorder %s1180_s13, %s1176_s12  ;;  %p108_p4 = scmp.eq.s32.totalorder %s841_s17, 3 }
   0x8   : > { %s1246_s21 = scalar_select %p89_p1, %s1184_s14, %s91_s19  }
   0x9   : > { %p1248_p5 = por %p102_p2, %p101_p0  ;;  %p1252_p6 = por %p108_p4, %p107_p3 }
   0xa   : > { %p844_p7 = scmp.ge.s32.totalorder %s1188_s15, 1  ;;  %p141_p8 = scmp.lt.s32.totalorder %s1188_s15, 5 }
   0xc   : > { %p142_p9 = pnand %p844_p7, %p141_p8 }
   0xd   : > { %s1258_s24 = sshll.u32 (!%p142_p9), %s840_s16, 6  ;;  %vm237_vm0 = vcmask (!%p142_p9), 261120   ;;  %v1263_v0 = vld [vmem:[%s1516_s0] sm:$0xff] (!%p142_p9)  ;;  %v1190_v2 = vmov (!%p142_p9), 0   ;;  %s162_s7 = sand.u32 (!%p142_p9), 1, %s1180_s13  }
   0xe   : > { %145 = sbr.rel (%p142_p9) target bundleno = 362 (0x16a), region = 32  ;;  %v575_v1 = vld [vmem:[%s1517_s1] sm:$0xff] (!%p142_p9)  ;;  %p166_p10 = scmp.lt.s32.totalorder (!%p142_p9), %s1258_s24, 255  ;;  %952 = vmatprep.mubr.msk.f32.mxu0 (!%p142_p9), %vm237_vm0, %v1263_v0  ;;  %986 = vmatprep.mubr.msk.f32.mxu1 (!%p142_p9), %vm237_vm0, %v1263_v0  ;;  %vm1281_vm1 = vmpackc.low (!%p142_p9), %vm237_vm0, %vm237_vm0 }
   0xf   : > { %1125 = vset.pattern.permute.xlu0 (!%p142_p9), %v1190_v2  ;;  %s845_s8 = sshll.u32 (!%p142_p9), %s162_s7, 2  ;;  %s1474_s17 = scalar_lea.hbm (!%p142_p9), %s1519_s3, %s1258_s24 }
  0x10   : > { %582 = vperm.xlu0 (!%p142_p9), %1125, %v575_v1   ;;  %s164_s9 = scalar_lea.vmem (!%p142_p9), [#allocation2], %s845_s8  ;;  %s768_s19 = scalar_lea.sflag (!%p142_p9), [#allocation3], %s162_s7 }
  0x11   : > { %s782_s10 = sshll.u32 (!%p142_p9), %s164_s9, 4  ;;  %s1192_s25 = smov (!%p142_p9), [#allocation2]   ;;  %s1476_s10 = int_to_ptr.vmem [resolvable:$true] %s782_s10 }
  0x12   : > { %s1126_s20 = scalar_lea.vmem (!%p142_p9), %s1476_s10, 64  ;;  %s1130_s26 = sshll.u32 (!%p142_p9), %s1192_s25, 4  ;;  %s1131_s26 = int_to_ptr.vmem [resolvable:$false] %s1130_s26 }
  0x13   : > { %p1127_p11 = scmp.ne.s32.totalorder (!%p142_p9), %s1476_s10, %s1126_s20  ;;  %s1132_s27 = scalar_lea.vmem (!%p142_p9), %s1131_s26, 128 }
  0x14   : > { %p1133_p0 = scmp.lt.s32.totalorder (!%p142_p9), %s1476_s10, %s1131_s26  ;;  %p1134_p1 = scmp.lt.s32.totalorder (!%p142_p9), %s1132_s27, %s1126_s20 }
  0x15   : > { %s167_s29 = scalar_select %p166_p10, %s1258_s24, 255 }
  0x16   : > { %p1128_p12 = pnand %p1127_p11, %p1248_p5  ;;  %p1135_p2 = por %p1134_p1, %p1133_p0 }
  0x17   : > { %s847_s30 = sshll.u32 %s167_s29, 3 }
  0x18   : > { %s1277_s6 = scalar_lea.vmem %s1518_s2, %s847_s30  ;;  %p1129_p13 = pneg %p1128_p12 }
  0x19   : > { %v189_v4 = vld [vmem:[%s1277_s6 + $0x80] sm:$0xff]  ;;  %v190_v5 = vld [vmem:[%s1277_s6 + $0x88] sm:$0xff]  ;;  %v191_v15 = vld [vmem:[%s1277_s6 + $0x90] sm:$0xff] }
  0x1a   : > { %v221_v6 = vld [vmem:[%s1277_s6 + $0x180] sm:$0xff]  ;;  %v988_v7 = vpack.c.bf16 %v190_v5, %v189_v4  ;;  %v222_v8 = vld [vmem:[%s1277_s6 + $0x188] sm:$0xff]  ;;  %v192_v17 = vld [vmem:[%s1277_s6 + $0x98] sm:$0xff]  ;;  %p1136_p3 = pnand %p1135_p2, %p1129_p13 }
  0x1b   : > { %v173_v9 = vld [vmem:[%s1277_s6] sm:$0xff]  ;;  %v174_v10 = vld [vmem:[%s1277_s6 + $0x8] sm:$0xff]  ;;  %v1036_v11 = vpack.c.bf16 %v222_v8, %v221_v6  ;;  %v223_v18 = vld [vmem:[%s1277_s6 + $0x190] sm:$0xff]  ;;  %v994_v20 = vpack.c.bf16 %v192_v17, %v191_v15 }
  0x1c   : > { %v991_v12 = vpack.c.bf16 %v174_v10, %v173_v9  ;;  %v205_v13 = vld [vmem:[%s1277_s6 + $0x100] sm:$0xff]  ;;  %v206_v14 = vld [vmem:[%s1277_s6 + $0x108] sm:$0xff]  ;;  %990 = vmatprep.subr.msk.bf16.mxu0 %vm1281_vm1, %v988_v7  ;;  %v224_v19 = vld [vmem:[%s1277_s6 + $0x198] sm:$0xff] }
  0x1d   : > { %v1039_v16 = vpack.c.bf16 %v206_v14, %v205_v13  ;;  %1038 = vmatprep.subr.msk.bf16.mxu1 %vm1281_vm1, %v1036_v11  ;;  %v1042_v21 = vpack.c.bf16 %v224_v19, %v223_v18  ;;  %v175_v22 = vld [vmem:[%s1277_s6 + $0x10] sm:$0xff]  ;;  %v176_v23 = vld [vmem:[%s1277_s6 + $0x18] sm:$0xff]  ;;  %v193_v26 = vld [vmem:[%s1277_s6 + $0xa0] sm:$0xff] }
  0x1e   : > { %993 = vmatpush3.bf16.xpose.msk.msra.mxu0 %vm1281_vm1, %v991_v12  ;;  %v207_v24 = vld [vmem:[%s1277_s6 + $0x110] sm:$0xff]  ;;  %v208_v25 = vld [vmem:[%s1277_s6 + $0x118] sm:$0xff]  ;;  %v194_v27 = vld [vmem:[%s1277_s6 + $0xa8] sm:$0xff]  ;;  %v997_v30 = vpack.c.bf16 %v176_v23, %v175_v22 }
  0x1f   : > { %1041 = vmatpush3.bf16.xpose.msk.msra.mxu1 %vm1281_vm1, %v1039_v16  ;;  %996 = vmatprep.subr.msk.bf16.mxu0 %vm1281_vm1, %v994_v20  ;;  %v225_v28 = vld [vmem:[%s1277_s6 + $0x1a0] sm:$0xff]  ;;  %v226_v29 = vld [vmem:[%s1277_s6 + $0x1a8] sm:$0xff]  ;;  %v1045_v31 = vpack.c.bf16 %v208_v25, %v207_v24  ;;  %v1000_v32 = vpack.c.bf16 %v194_v27, %v193_v26  ;;  %v195_v38 = vld [vmem:[%s1277_s6 + $0xb0] sm:$0xff] }
  0x20   : > { %1044 = vmatprep.subr.msk.bf16.mxu1 %vm1281_vm1, %v1042_v21  ;;  %v1048_v33 = vpack.c.bf16 %v226_v29, %v225_v28  ;;  %v177_v34 = vld [vmem:[%s1277_s6 + $0x20] sm:$0xff]  ;;  %v178_v35 = vld [vmem:[%s1277_s6 + $0x28] sm:$0xff]  ;;  %v196_v39 = vld [vmem:[%s1277_s6 + $0xb8] sm:$0xff] }
  0x21   : > { %v209_v36 = vld [vmem:[%s1277_s6 + $0x120] sm:$0xff]  ;;  %v210_v37 = vld [vmem:[%s1277_s6 + $0x128] sm:$0xff]  ;;  %v227_v40 = vld [vmem:[%s1277_s6 + $0x1b0] sm:$0xff]  ;;  %v1003_v42 = vpack.c.bf16 %v178_v35, %v177_v34  ;;  %v1006_v44 = vpack.c.bf16 %v196_v39, %v195_v38 }
  0x22   : > { %v228_v41 = vld [vmem:[%s1277_s6 + $0x1b8] sm:$0xff]  ;;  %v1051_v43 = vpack.c.bf16 %v210_v37, %v209_v36  ;;  %v179_v46 = vld [vmem:[%s1277_s6 + $0x30] sm:$0xff]  ;;  %v197_v50 = vld [vmem:[%s1277_s6 + $0xc0] sm:$0xff] }
  0x23   : > { %v1054_v45 = vpack.c.bf16 %v228_v41, %v227_v40  ;;  %v180_v47 = vld [vmem:[%s1277_s6 + $0x38] sm:$0xff]  ;;  %v211_v48 = vld [vmem:[%s1277_s6 + $0x130] sm:$0xff]  ;;  %v198_v51 = vld [vmem:[%s1277_s6 + $0xc8] sm:$0xff]  ;;  %v742_v40 = vlaneseq }
  0x24   : > { %v212_v49 = vld [vmem:[%s1277_s6 + $0x138] sm:$0xff]  ;;  %v229_v52 = vld [vmem:[%s1277_s6 + $0x1c0] sm:$0xff]  ;;  %v230_v53 = vld [vmem:[%s1277_s6 + $0x1c8] sm:$0xff]  ;;  %v1009_v54 = vpack.c.bf16 %v180_v47, %v179_v46  ;;  %v1012_v56 = vpack.c.bf16 %v198_v51, %v197_v50  ;;  %v1191_v50 = vmov 1966171168  }
  0x25   : > { %v1057_v55 = vpack.c.bf16 %v212_v49, %v211_v48  ;;  %v1060_v57 = vpack.c.bf16 %v230_v53, %v229_v52  ;;  %v181_v58 = vld [vmem:[%s1277_s6 + $0x40] sm:$0xff]  ;;  %v182_v59 = vld [vmem:[%s1277_s6 + $0x48] sm:$0xff]  ;;  %v199_v62 = vld [vmem:[%s1277_s6 + $0xd0] sm:$0xff]  ;;  %v1423_v51 = vunpack.c.l.s4 %v1191_v50  ;;  %vm764_vm2 = vcmp.lt.s32.totalorder %v742_v40, 512 }
  0x26   : > { %999 = vmatpush3.bf16.xpose.msk.msra.mxu0 %vm1281_vm1, %v997_v30  ;;  %v213_v60 = vld [vmem:[%s1277_s6 + $0x140] sm:$0xff]  ;;  %v214_v61 = vld [vmem:[%s1277_s6 + $0x148] sm:$0xff]  ;;  %v200_v63 = vld [vmem:[%s1277_s6 + $0xd8] sm:$0xff]  ;;  %v1015_v4 = vpack.c.bf16 %v182_v59, %v181_v58 }
  0x27   : > { %1047 = vmatpush3.bf16.xpose.msk.msra.mxu1 %vm1281_vm1, %v1045_v31  ;;  %1002 = vmatprep.subr.msk.bf16.mxu0 %vm1281_vm1, %v1000_v32  ;;  %v231_v1 = vld [vmem:[%s1277_s6 + $0x1d0] sm:$0xff]  ;;  %v232_v2 = vld [vmem:[%s1277_s6 + $0x1d8] sm:$0xff]  ;;  %v1063_v5 = vpack.c.bf16 %v214_v61, %v213_v60  ;;  %v1018_v6 = vpack.c.bf16 %v200_v63, %v199_v62  ;;  %v201_v12 = vld [vmem:[%s1277_s6 + $0xe0] sm:$0xff] }
  0x28   : > { %1050 = vmatprep.subr.msk.bf16.mxu1 %vm1281_vm1, %v1048_v33  ;;  %v1066_v7 = vpack.c.bf16 %v232_v2, %v231_v1  ;;  %v183_v8 = vld [vmem:[%s1277_s6 + $0x50] sm:$0xff]  ;;  %v184_v9 = vld [vmem:[%s1277_s6 + $0x58] sm:$0xff]  ;;  %v202_v13 = vld [vmem:[%s1277_s6 + $0xe8] sm:$0xff] }
  0x29   : > { %v215_v10 = vld [vmem:[%s1277_s6 + $0x150] sm:$0xff]  ;;  %v216_v11 = vld [vmem:[%s1277_s6 + $0x158] sm:$0xff]  ;;  %v233_v14 = vld [vmem:[%s1277_s6 + $0x1e0] sm:$0xff]  ;;  %v1021_v16 = vpack.c.bf16 %v184_v9, %v183_v8  ;;  %v1024_v18 = vpack.c.bf16 %v202_v13, %v201_v12 }
  0x2a   : > { %v234_v15 = vld [vmem:[%s1277_s6 + $0x1e8] sm:$0xff]  ;;  %v1069_v17 = vpack.c.bf16 %v216_v11, %v215_v10  ;;  %v185_v20 = vld [vmem:[%s1277_s6 + $0x60] sm:$0xff]  ;;  %v203_v24 = vld [vmem:[%s1277_s6 + $0xf0] sm:$0xff] }
  0x2b   : > { %v1072_v19 = vpack.c.bf16 %v234_v15, %v233_v14  ;;  %v186_v21 = vld [vmem:[%s1277_s6 + $0x68] sm:$0xff]  ;;  %v217_v22 = vld [vmem:[%s1277_s6 + $0x160] sm:$0xff]  ;;  %v204_v25 = vld [vmem:[%s1277_s6 + $0xf8] sm:$0xff] }
  0x2c   : > { %v218_v23 = vld [vmem:[%s1277_s6 + $0x168] sm:$0xff]  ;;  %v235_v26 = vld [vmem:[%s1277_s6 + $0x1f0] sm:$0xff]  ;;  %v236_v27 = vld [vmem:[%s1277_s6 + $0x1f8] sm:$0xff]  ;;  %v1027_v28 = vpack.c.bf16 %v186_v21, %v185_v20  ;;  %v1030_v30 = vpack.c.bf16 %v204_v25, %v203_v24 }
  0x2d   : > { %v1075_v29 = vpack.c.bf16 %v218_v23, %v217_v22  ;;  %v1078_v31 = vpack.c.bf16 %v236_v27, %v235_v26  ;;  %v187_v32 = vld [vmem:[%s1277_s6 + $0x70] sm:$0xff]  ;;  %v188_v33 = vld [vmem:[%s1277_s6 + $0x78] sm:$0xff] }
  0x2e   : > { %1005 = vmatpush3.bf16.xpose.msk.msra.mxu0 %vm1281_vm1, %v1003_v42  ;;  %v219_v34 = vld [vmem:[%s1277_s6 + $0x170] sm:$0xff]  ;;  %v220_v35 = vld [vmem:[%s1277_s6 + $0x178] sm:$0xff]  ;;  %v1033_v36 = vpack.c.bf16 %v188_v33, %v187_v32 }
  0x2f   : > { %1053 = vmatpush3.bf16.xpose.msk.msra.mxu1 %vm1281_vm1, %v1051_v43  ;;  %1008 = vmatprep.subr.msk.bf16.mxu0 %vm1281_vm1, %v1006_v44  ;;  %v1081_v37 = vpack.c.bf16 %v220_v35, %v219_v34 }
  0x30   : > { %1056 = vmatprep.subr.msk.bf16.mxu1 %vm1281_vm1, %v1054_v45 }
  0x36   : > { %1011 = vmatpush3.bf16.xpose.msk.msra.mxu0 %vm1281_vm1, %v1009_v54 }
  0x37   : > { %1059 = vmatpush3.bf16.xpose.msk.msra.mxu1 %vm1281_vm1, %v1057_v55  ;;  %1014 = vmatprep.subr.msk.bf16.mxu0 %vm1281_vm1, %v1012_v56 }
  0x38   : > { %1062 = vmatprep.subr.msk.bf16.mxu1 %vm1281_vm1, %v1060_v57 }
  0x3e   : > { %1017 = vmatpush3.bf16.xpose.msk.msra.mxu0 %vm1281_vm1, %v1015_v4 }
  0x3f   : > { %1065 = vmatpush3.bf16.xpose.msk.msra.mxu1 %vm1281_vm1, %v1063_v5  ;;  %1020 = vmatprep.subr.msk.bf16.mxu0 %vm1281_vm1, %v1018_v6 }
  0x40   : > { %1068 = vmatprep.subr.msk.bf16.mxu1 %vm1281_vm1, %v1066_v7 }
  0x46   : > { %1023 = vmatpush3.bf16.xpose.msk.msra.mxu0 %vm1281_vm1, %v1021_v16 }
  0x47   : > { %1071 = vmatpush3.bf16.xpose.msk.msra.mxu1 %vm1281_vm1, %v1069_v17  ;;  %1026 = vmatprep.subr.msk.bf16.mxu0 %vm1281_vm1, %v1024_v18 }
  0x48   : > { %1074 = vmatprep.subr.msk.bf16.mxu1 %vm1281_vm1, %v1072_v19 }
  0x4e   : > { %1029 = vmatpush3.bf16.xpose.msk.msra.mxu0 %vm1281_vm1, %v1027_v28 }
  0x4f   : > { %1077 = vmatpush3.bf16.xpose.msk.msra.mxu1 %vm1281_vm1, %v1075_v29  ;;  %1032 = vmatprep.subr.msk.bf16.mxu0 %vm1281_vm1, %v1030_v30 }
  0x50   : > { %1080 = vmatprep.subr.msk.bf16.mxu1 %vm1281_vm1, %v1078_v31 }
  0x56   : > { %1035 = vmatpush3.bf16.xpose.msk.msra.mxu0 %vm1281_vm1, %v1033_v36 }
  0x57   : > { %1083 = vmatpush3.bf16.xpose.msk.msra.mxu1 %vm1281_vm1, %v1081_v37 }
  0x5d   : > { %953 = vmatmul.mubr.msk.f32.vlgmr.msra.gmra.mrb[0].mxu0 %vm237_vm0, %v1263_v0 }
  0x5e   : > { %987 = vmatmul.mubr.msk.f32.vlgmr.msra.gmra.mrb[0].mxu1 %vm237_vm0, %v1263_v0  ;;  %v1426_v0 = vshrl.u32 %v742_v40, 7 }
  0x8f   : > { %v583_v39 = vpop.permute.xlu0 %582 }
 0x130   : > { %v499_v38 = vpop.f32.mrb[0].mxu0 }
 0x131   : > { %v576_v41 = vmul.f32 2.0, %v499_v38  ;;  %v570_v42 = vpop.f32.mrb[0].mxu1  ;;  %v501_v43 = vpop.f32.mrb[1].mxu0 }
 0x132   : > { %v578_v44 = vmul.f32 2.0, %v570_v42  ;;  %v577_v45 = vmul.f32 2.0, %v501_v43  ;;  %v572_v46 = vpop.f32.mrb[1].mxu1 }
 0x133   : > { %v579_v47 = vmul.f32 2.0, %v572_v46  ;;  %v1417_v48 = vsub.f32 %v583_v39, %v576_v41 }
 0x134   : > { %v1419_v3 = vsub.f32 %v583_v39, %v577_v45  ;;  %v1421_v49 = vsub.f32 %v583_v39, %v578_v44 }
 0x135   : > { %v1428_v52 = vsub.f32 %v583_v39, %v579_v47  ;;  %v593_v53 = vrot.slane %v1417_v48, 1  ;;  %v609_v54 = vrot.slane %v1417_v48, 2  ;;  %v629_v55 = vrot.slane %v1417_v48, 3 }
 0x136   : > { %v594_v56 = vrot.slane %v1419_v3, 1  ;;  %v595_v57 = vrot.slane %v1421_v49, 1  ;;  %v610_v58 = vrot.slane %v1419_v3, 2  ;;  %v611_v59 = vrot.slane %v1421_v49, 2 }
 0x137   : > { %v596_v60 = vrot.slane %v1428_v52, 1  ;;  %v601_v61 = vmin.f32 %v1417_v48, %v593_v53  ;;  %v605_v62 = vmax.f32 %v1417_v48, %v593_v53  ;;  %v612_v63 = vrot.slane %v1428_v52, 2 }
 0x138   : > { %v602_v1 = vmin.f32 %v1419_v3, %v594_v56  ;;  %v603_v2 = vmin.f32 %v1421_v49, %v595_v57  ;;  %v606_v4 = vmax.f32 %v1419_v3, %v594_v56  ;;  %v607_v5 = vmax.f32 %v1421_v49, %v595_v57 }
 0x139   : > { %v604_v6 = vmin.f32 %v1428_v52, %v596_v60  ;;  %v608_v7 = vmax.f32 %v1428_v52, %v596_v60  ;;  %v617_v8 = vmax.f32 %v601_v61, %v609_v54  ;;  %v625_v9 = vmin.f32 %v601_v61, %v609_v54 }
 0x13a   : > { %v618_v10 = vmax.f32 %v602_v1, %v610_v58  ;;  %v619_v11 = vmax.f32 %v603_v2, %v611_v59  ;;  %v626_v12 = vmin.f32 %v602_v1, %v610_v58  ;;  %v627_v13 = vmin.f32 %v603_v2, %v611_v59 }
 0x13b   : > { %v620_v14 = vmax.f32 %v604_v6, %v612_v63  ;;  %v621_v15 = vmin.f32 %v605_v62, %v617_v8  ;;  %v628_v16 = vmin.f32 %v604_v6, %v612_v63  ;;  %v630_v17 = vrot.slane %v1419_v3, 3 }
 0x13c   : > { %v622_v18 = vmin.f32 %v606_v4, %v618_v10  ;;  %v623_v19 = vmin.f32 %v607_v5, %v619_v11  ;;  %v631_v20 = vrot.slane %v1421_v49, 3  ;;  %v632_v21 = vrot.slane %v1428_v52, 3 }
 0x13d   : > { %v624_v22 = vmin.f32 %v608_v7, %v620_v14  ;;  %v637_v23 = vmax.f32 %v625_v9, %v629_v55  ;;  %v638_v24 = vmax.f32 %v626_v12, %v630_v17  ;;  %v645_v25 = vmin.f32 %v625_v9, %v629_v55 }
 0x13e   : > { %v639_v26 = vmax.f32 %v627_v13, %v631_v20  ;;  %v640_v27 = vmax.f32 %v628_v16, %v632_v21  ;;  %v646_v28 = vmin.f32 %v626_v12, %v630_v17  ;;  %v647_v29 = vmin.f32 %v627_v13, %v631_v20 }
 0x13f   : > { %v641_v30 = vmin.f32 %v621_v15, %v637_v23  ;;  %v642_v31 = vmin.f32 %v622_v18, %v638_v24  ;;  %v648_v32 = vmin.f32 %v628_v16, %v632_v21  ;;  %v649_v33 = vrot.slane %v1417_v48, 4 }
 0x140   : > { %v643_v34 = vmin.f32 %v623_v19, %v639_v26  ;;  %v644_v35 = vmin.f32 %v624_v22, %v640_v27  ;;  %v650_v36 = vrot.slane %v1419_v3, 4  ;;  %v651_v37 = vrot.slane %v1421_v49, 4 }
 0x141   : > { %v652_v38 = vrot.slane %v1428_v52, 4  ;;  %v657_v39 = vmax.f32 %v645_v25, %v649_v33  ;;  %v665_v41 = vmin.f32 %v645_v25, %v649_v33  ;;  %v669_v42 = vrot.slane %v1417_v48, 5 }
 0x142   : > { %v658_v43 = vmax.f32 %v646_v28, %v650_v36  ;;  %v659_v44 = vmax.f32 %v647_v29, %v651_v37  ;;  %v666_v45 = vmin.f32 %v646_v28, %v650_v36  ;;  %v667_v46 = vmin.f32 %v647_v29, %v651_v37 }
 0x143   : > { %v660_v47 = vmax.f32 %v648_v32, %v652_v38  ;;  %v661_v50 = vmin.f32 %v641_v30, %v657_v39  ;;  %v668_v53 = vmin.f32 %v648_v32, %v652_v38  ;;  %v670_v54 = vrot.slane %v1419_v3, 5 }
 0x144   : > { %v662_v55 = vmin.f32 %v642_v31, %v658_v43  ;;  %v663_v56 = vmin.f32 %v643_v34, %v659_v44  ;;  %v671_v57 = vrot.slane %v1421_v49, 5  ;;  %v672_v58 = vrot.slane %v1428_v52, 5 }
 0x145   : > { %v664_v59 = vmin.f32 %v644_v35, %v660_v47  ;;  %v677_v60 = vmax.f32 %v665_v41, %v669_v42  ;;  %v678_v61 = vmax.f32 %v666_v45, %v670_v54  ;;  %v685_v62 = vmin.f32 %v665_v41, %v669_v42 }
 0x146   : > { %v679_v63 = vmax.f32 %v667_v46, %v671_v57  ;;  %v680_v1 = vmax.f32 %v668_v53, %v672_v58  ;;  %v686_v2 = vmin.f32 %v666_v45, %v670_v54  ;;  %v687_v4 = vmin.f32 %v667_v46, %v671_v57 }
 0x147   : > { %v681_v5 = vmin.f32 %v661_v50, %v677_v60  ;;  %v682_v6 = vmin.f32 %v662_v55, %v678_v61  ;;  %v688_v7 = vmin.f32 %v668_v53, %v672_v58  ;;  %v689_v8 = vrot.slane %v1417_v48, 6 }
 0x148   : > { %v683_v9 = vmin.f32 %v663_v56, %v679_v63  ;;  %v684_v10 = vmin.f32 %v664_v59, %v680_v1  ;;  %v690_v11 = vrot.slane %v1419_v3, 6  ;;  %v691_v12 = vrot.slane %v1421_v49, 6 }
 0x149   : > { %v692_v13 = vrot.slane %v1428_v52, 6  ;;  %v697_v14 = vmax.f32 %v685_v62, %v689_v8  ;;  %v705_v15 = vmin.f32 %v685_v62, %v689_v8  ;;  %v709_v16 = vrot.slane %v1417_v48, 7 }
 0x14a   : > { %v698_v17 = vmax.f32 %v686_v2, %v690_v11  ;;  %v699_v18 = vmax.f32 %v687_v4, %v691_v12  ;;  %v706_v19 = vmin.f32 %v686_v2, %v690_v11  ;;  %v707_v20 = vmin.f32 %v687_v4, %v691_v12 }
 0x14b   : > { %v700_v21 = vmax.f32 %v688_v7, %v692_v13  ;;  %v701_v22 = vmin.f32 %v681_v5, %v697_v14  ;;  %v708_v23 = vmin.f32 %v688_v7, %v692_v13  ;;  %v710_v24 = vrot.slane %v1419_v3, 7 }
 0x14c   : > { %v702_v25 = vmin.f32 %v682_v6, %v698_v17  ;;  %v703_v26 = vmin.f32 %v683_v9, %v699_v18  ;;  %v711_v27 = vrot.slane %v1421_v49, 7  ;;  %v712_v28 = vrot.slane %v1428_v52, 7 }
 0x14d   : > { %v704_v29 = vmin.f32 %v684_v10, %v700_v21  ;;  %v717_v30 = vmax.f32 %v705_v15, %v709_v16  ;;  %v718_v31 = vmax.f32 %v706_v19, %v710_v24  ;;  %v741_v48 = vunpack.c.0.s8 %v1423_v51 }
 0x14e   : > { %v719_v32 = vmax.f32 %v707_v20, %v711_v27  ;;  %v720_v33 = vmax.f32 %v708_v23, %v712_v28  ;;  %v725_v36 = vmin.f32 %v705_v15, %v709_v16  ;;  %v726_v37 = vmin.f32 %v706_v19, %v710_v24 }
 0x14f   : > { %v721_v34 = vmin.f32 %v701_v22, %v717_v30  ;;  %v722_v35 = vmin.f32 %v702_v25, %v718_v31  ;;  %v727_v39 = vmin.f32 %v707_v20, %v711_v27  ;;  %v728_v41 = vmin.f32 %v708_v23, %v712_v28 }
 0x150   : > { %v723_v38 = vmin.f32 %v703_v26, %v719_v32  ;;  %v724_v3 = vmin.f32 %v704_v29, %v720_v33  ;;  %v744_v42 = vsub.s32 %v741_v48, %v1426_v0 }
 0x151   : > { %v729_v49 = vsub.f32 %v721_v34, %v725_v36  ;;  %v730_v52 = vsub.f32 %v722_v35, %v726_v37 }
 0x152   : > { %v731_v43 = vsub.f32 %v723_v38, %v727_v39  ;;  %v732_v44 = vsub.f32 %v724_v3, %v728_v41 }
 0x153   : > { %v737_v51 = vcombine.low %v729_v49, %v730_v52 }
 0x154   : > { %v738_v45 = vcombine.low %v731_v43, %v732_v44 }
 0x155   : > { %v745_v46 = vrot.slane %v737_v51, %v744_v42 }
 0x156   : > { %v752_v47 = vrot.slane %v738_v45, %v744_v42 }
 0x158   : > { %v753_v50 = vcombine.low %v745_v46, %v752_v47 }
 0x15a   : > { %v760_v53 = vrot.slane %v753_v50, %v744_v42 }
 0x15c   : > { %766 = vst.msk [vmem:[%s164_s9] sm:$0xf] %vm764_vm2, %v760_v53 }
 0x15d   : > { %1139 = shalt.err (!%p1136_p3)
}
 0x15e   : > { %s1140_s24 = scalar_lea.hbm %s1474_s17, 64  ;;  %s1144_s30 = scalar_lea.hbm %s1519_s3, 256 }
 0x15f   : > { %p1141_p4 = scmp.ne.s32.totalorder %s1474_s17, %s1140_s24  ;;  %p1145_p9 = scmp.lt.u32.totalorder %s1474_s17, %s1519_s3 }
 0x160   : > { %p1146_p10 = scmp.lt.u32.totalorder %s1144_s30, %s1140_s24  ;;  %p1148_p12 = scmp.lt.u32.totalorder %s1140_s24, %s1474_s17 }
 0x161   : > { %p1142_p7 = pnand %p1141_p4, %p1248_p5 }
 0x162   : > { %p1147_p11 = por %p1146_p10, %p1145_p9 }
 0x163   : > { %p1143_p8 = pneg %p1142_p7 }
 0x164   : > { %p1149_p13 = por %p1148_p12, %p1147_p11 }
 0x166   : > { %p1150_p0 = pnand %p1149_p13, %p1143_p8 }
 0x168   : > { %1153 = shalt.err (!%p1150_p0)
}
 0x169   : > { %1084 = dma.vmem_to_hbm [thread:$0]  (%p1248_p5), %s1476_s10, 64, %s1474_s17, %s768_s19  }
 0x16a PF: > { %p1090_p1 = scmp.ge.s32.totalorder %s1188_s15, 2  ;;  %s794_s6 = sand.u32 1, %s1176_s12  }
 0x16b   : > { %s795_s7 = scalar_lea.sflag [#allocation3], %s794_s6 }
 0x16c   : > { %p1087_p2 = pnand %p1090_p1, %p1252_p6 }
 0x16e   : > { %1171 = dma.done.wait (!%p1087_p2), %s795_s7, 64  }
 0x16f   : > { %1173 = vsyncadd (!%p1087_p2), %s795_s7, 4294967232  ;;  %p13_p3 = scmp.ge.s32.totalorder %s1236_s18, 6   ;;  %s1524_s12 = smov %s1180_s13 }
 0x170   : > { %s1525_s13 = smov %s1184_s14  ;;  %s1526_s14 = smov %s1246_s21 }
 0x171   : > { %s1527_s15 = smov %s1236_s18  ;;  %15 = sbr.rel (!%p13_p3) target bundleno = 3 (0x3), region = 67 }
 0x178   :  { %800 = vsyncpa [#allocation3], 1 }
 0x179   :  { %802 = vsyncpa [#allocation3 + $0x1], 1 }

</bundles_post_ra>
